<compile_context>
chip_gen: v7x
topology: tpu7x:2x2x1
jax: 0.10.0
libtpu: 0.0.40
codegen_flags: <defaults>
</compile_context>

<pallas_src>
import jax
import jax.numpy as jnp
from jax.experimental import pallas as pl
from jax.experimental.pallas import tpu as pltpu

LANE = 128


def rnn_net_kernel(x_ref, w_ih_ref, w_hh_ref, b_rnn_ref, w_out_ref, b_out_ref,
                   out_ref):
    """Whole forward pass in one grid-less kernel invocation.

    x_ref is (T, B) — time on the major axis. All parameters are VMEM-resident
    whole arrays. The recurrence is fully unrolled; only matmul -> add -> tanh
    sits on the serial dependency chain per step.
    """
    T, B = x_ref.shape
    H = w_hh_ref.shape[0]

    w_hh = w_hh_ref[...]                                   # (H, H), pre-transposed

    # Hoisted input projection + bias, computed once off the critical path:
    #   pre_in[t] = x[:, t:t+1] * W_ih^T + (b_ih + b_hh)      shape (T, B, H)
    pre_in = x_ref[...][:, :, None] * w_ih_ref[...] + b_rnn_ref[...]

    # Fully-unrolled recurrence (T is a static shape constant).
    # TODO(synk): could hold w_hh in MXU weight regs across steps via
    # pltpu.matmul_push_rhs / matmul_acc_lhs / matmul_pop; kept jnp.dot for
    # robust lowering — Mosaic already keeps the constant RHS VMEM-resident.
    h = jnp.zeros((B, H), dtype=jnp.float32)
    for t in range(T):
        h = jnp.tanh(pre_in[t]
                     + jnp.dot(h, w_hh, preferred_element_type=jnp.float32))

    # Lane-dense output store: w_out/b_out are padded to a 128-lane slab.
    out_ref[...] = (jnp.dot(h, w_out_ref[...],
                            preferred_element_type=jnp.float32)
                    + b_out_ref[...])


def rnn_net_forward(x, w_ih, w_hh_t, b_rnn, w_out_t, b_out):
    """x: (B, T) float32; returns (B, O) float32."""
    B, T = x.shape
    H, O = w_out_t.shape

    # Lane-dense output slab: pad O up to a multiple of 128 with zero columns.
    O_pad = ((O + LANE - 1) // LANE) * LANE
    w_out_p = jnp.zeros((H, O_pad), jnp.float32).at[:, :O].set(w_out_t)
    b_out_p = jnp.zeros((1, O_pad), jnp.float32).at[:, :O].set(b_out)

    # Time on the major axis so per-step indexing is a whole-vreg select.
    x_tb = x.T                                             # (T, B)

    vmem = pl.BlockSpec(memory_space=pltpu.MemorySpace.VMEM)
    out_p = pl.pallas_call(
        rnn_net_kernel,
        out_shape=jax.ShapeDtypeStruct((B, O_pad), jnp.float32),
        in_specs=[vmem] * 6,
        out_specs=vmem,
    )(x_tb, w_ih, w_hh_t, b_rnn, w_out_p, b_out_p)

    return out_p[:, :O]


def rnn_net_reference(x, w_ih, w_hh_t, b_rnn, w_out_t, b_out):
    """Pure-JAX reference for verification."""
    B, T = x.shape
    H = w_hh_t.shape[0]
    h = jnp.zeros((B, H), jnp.float32)
    for t in range(T):
        x_t = x[:, t:t + 1]
        h = jnp.tanh(x_t * w_ih + h @ w_hh_t + b_rnn)
    return h @ w_out_t + b_out


if __name__ == "__main__":
    import numpy as np

    B, T = 8, 8          # batch, sequence length
    n_feature = 1        # forced to 1 by x.unsqueeze(2) in the PyTorch forward
    n_hidden = 32
    n_output = 4

    key = jax.random.PRNGKey(0)
    kx, k1, k2, k3, k4, k5, k6 = jax.random.split(key, 7)

    # deterministic "PyTorch-style" init: U(-1/sqrt(H), 1/sqrt(H))
    bound = 1.0 / np.sqrt(n_hidden)
    u = lambda k, shape: jax.random.uniform(k, shape, jnp.float32, -bound, bound)

    # PyTorch parameter shapes, stored pre-transposed for row-vector matmuls.
    w_ih = u(k1, (n_feature, n_hidden))                      # weight_ih_l0.T  (1, H)
    w_hh_t = u(k2, (n_hidden, n_hidden))                     # weight_hh_l0.T  (H, H)
    b_rnn = (u(k3, (1, n_hidden)) + u(k4, (1, n_hidden)))    # b_ih + b_hh
    w_out_t = u(k5, (n_hidden, n_output))                    # output.weight.T (H, O)
    b_out = u(k6, (1, n_output))                             # output.bias     (1, O)

    x = jax.random.normal(kx, (B, T), jnp.float32)

    out = rnn_net_forward(x, w_ih, w_hh_t, b_rnn, w_out_t, b_out)
    out = jax.block_until_ready(out)

    ref = rnn_net_reference(x, w_ih, w_hh_t, b_rnn, w_out_t, b_out)
    np.testing.assert_allclose(np.asarray(out), np.asarray(ref),
                               rtol=1e-5, atol=1e-5)

    print("KERNEL_OK")
</pallas_src>

<mosaic_0001>
module attributes {stable_mosaic.version = 11 : i64} {
  func.func @rnn_net_kernel(%arg0: memref<8x8xf32, #tpu.memory_space<vmem>>, %arg1: memref<1x32xf32, #tpu.memory_space<vmem>>, %arg2: memref<32x32xf32, #tpu.memory_space<vmem>>, %arg3: memref<1x32xf32, #tpu.memory_space<vmem>>, %arg4: memref<32x128xf32, #tpu.memory_space<vmem>>, %arg5: memref<1x128xf32, #tpu.memory_space<vmem>>, %arg6: memref<8x128xf32, #tpu.memory_space<vmem>>) attributes {dimension_semantics = [], scalar_prefetch = 0 : i64, scratch_operands = 0 : i64, tpu.core_type = #tpu.core_type<tc>} {
    %c0 = arith.constant 0 : index
    %c0_0 = arith.constant 0 : index
    %0 = vector.load %arg2[%c0, %c0_0] : memref<32x32xf32, #tpu.memory_space<vmem>>, vector<32x32xf32>
    %c0_1 = arith.constant 0 : index
    %c0_2 = arith.constant 0 : index
    %1 = vector.load %arg0[%c0_1, %c0_2] : memref<8x8xf32, #tpu.memory_space<vmem>>, vector<8x8xf32>
    %2 = vector.shape_cast %1 : vector<8x8xf32> to vector<8x8x1xf32>
    %c0_3 = arith.constant 0 : index
    %c0_4 = arith.constant 0 : index
    %3 = vector.load %arg1[%c0_3, %c0_4] : memref<1x32xf32, #tpu.memory_space<vmem>>, vector<1x32xf32>
    %4 = vector.shape_cast %3 : vector<1x32xf32> to vector<1x1x32xf32>
    %5 = vector.broadcast %2 : vector<8x8x1xf32> to vector<8x8x32xf32>
    %6 = vector.broadcast %4 : vector<1x1x32xf32> to vector<8x8x32xf32>
    %7 = arith.mulf %5, %6 : vector<8x8x32xf32>
    %c0_5 = arith.constant 0 : index
    %c0_6 = arith.constant 0 : index
    %8 = vector.load %arg3[%c0_5, %c0_6] : memref<1x32xf32, #tpu.memory_space<vmem>>, vector<1x32xf32>
    %9 = vector.shape_cast %8 : vector<1x32xf32> to vector<1x1x32xf32>
    %10 = vector.broadcast %9 : vector<1x1x32xf32> to vector<8x8x32xf32>
    %11 = arith.addf %7, %10 : vector<8x8x32xf32>
    %cst = arith.constant 0.000000e+00 : f32
    %12 = vector.broadcast %cst : f32 to vector<8x32xf32>
    %13 = vector.extract_strided_slice %11 {offsets = [0, 0, 0], sizes = [1, 8, 32], strides = [1, 1, 1]} : vector<8x8x32xf32> to vector<1x8x32xf32>
    %14 = vector.shape_cast %13 : vector<1x8x32xf32> to vector<8x32xf32>
    %cst_7 = arith.constant dense<0.000000e+00> : vector<8x32xf32>
    %15 = tpu.matmul %12, %0, %cst_7 {dimension_numbers = #tpu.dot_dimension_numbers<[1], [0], [0], [1], [0, 0, 1, 1], [], []>} : vector<8x32xf32>, vector<32x32xf32>, vector<8x32xf32> -> vector<8x32xf32>
    %16 = arith.addf %14, %15 : vector<8x32xf32>
    %17 = math.tanh %16 : vector<8x32xf32>
    %18 = vector.extract_strided_slice %11 {offsets = [1, 0, 0], sizes = [1, 8, 32], strides = [1, 1, 1]} : vector<8x8x32xf32> to vector<1x8x32xf32>
    %19 = vector.shape_cast %18 : vector<1x8x32xf32> to vector<8x32xf32>
    %cst_8 = arith.constant dense<0.000000e+00> : vector<8x32xf32>
    %20 = tpu.matmul %17, %0, %cst_8 {dimension_numbers = #tpu.dot_dimension_numbers<[1], [0], [0], [1], [0, 0, 1, 1], [], []>} : vector<8x32xf32>, vector<32x32xf32>, vector<8x32xf32> -> vector<8x32xf32>
    %21 = arith.addf %19, %20 : vector<8x32xf32>
    %22 = math.tanh %21 : vector<8x32xf32>
    %23 = vector.extract_strided_slice %11 {offsets = [2, 0, 0], sizes = [1, 8, 32], strides = [1, 1, 1]} : vector<8x8x32xf32> to vector<1x8x32xf32>
    %24 = vector.shape_cast %23 : vector<1x8x32xf32> to vector<8x32xf32>
    %cst_9 = arith.constant dense<0.000000e+00> : vector<8x32xf32>
    %25 = tpu.matmul %22, %0, %cst_9 {dimension_numbers = #tpu.dot_dimension_numbers<[1], [0], [0], [1], [0, 0, 1, 1], [], []>} : vector<8x32xf32>, vector<32x32xf32>, vector<8x32xf32> -> vector<8x32xf32>
    %26 = arith.addf %24, %25 : vector<8x32xf32>
    %27 = math.tanh %26 : vector<8x32xf32>
    %28 = vector.extract_strided_slice %11 {offsets = [3, 0, 0], sizes = [1, 8, 32], strides = [1, 1, 1]} : vector<8x8x32xf32> to vector<1x8x32xf32>
    %29 = vector.shape_cast %28 : vector<1x8x32xf32> to vector<8x32xf32>
    %cst_10 = arith.constant dense<0.000000e+00> : vector<8x32xf32>
    %30 = tpu.matmul %27, %0, %cst_10 {dimension_numbers = #tpu.dot_dimension_numbers<[1], [0], [0], [1], [0, 0, 1, 1], [], []>} : vector<8x32xf32>, vector<32x32xf32>, vector<8x32xf32> -> vector<8x32xf32>
    %31 = arith.addf %29, %30 : vector<8x32xf32>
    %32 = math.tanh %31 : vector<8x32xf32>
    %33 = vector.extract_strided_slice %11 {offsets = [4, 0, 0], sizes = [1, 8, 32], strides = [1, 1, 1]} : vector<8x8x32xf32> to vector<1x8x32xf32>
    %34 = vector.shape_cast %33 : vector<1x8x32xf32> to vector<8x32xf32>
    %cst_11 = arith.constant dense<0.000000e+00> : vector<8x32xf32>
    %35 = tpu.matmul %32, %0, %cst_11 {dimension_numbers = #tpu.dot_dimension_numbers<[1], [0], [0], [1], [0, 0, 1, 1], [], []>} : vector<8x32xf32>, vector<32x32xf32>, vector<8x32xf32> -> vector<8x32xf32>
    %36 = arith.addf %34, %35 : vector<8x32xf32>
    %37 = math.tanh %36 : vector<8x32xf32>
    %38 = vector.extract_strided_slice %11 {offsets = [5, 0, 0], sizes = [1, 8, 32], strides = [1, 1, 1]} : vector<8x8x32xf32> to vector<1x8x32xf32>
    %39 = vector.shape_cast %38 : vector<1x8x32xf32> to vector<8x32xf32>
    %cst_12 = arith.constant dense<0.000000e+00> : vector<8x32xf32>
    %40 = tpu.matmul %37, %0, %cst_12 {dimension_numbers = #tpu.dot_dimension_numbers<[1], [0], [0], [1], [0, 0, 1, 1], [], []>} : vector<8x32xf32>, vector<32x32xf32>, vector<8x32xf32> -> vector<8x32xf32>
    %41 = arith.addf %39, %40 : vector<8x32xf32>
    %42 = math.tanh %41 : vector<8x32xf32>
    %43 = vector.extract_strided_slice %11 {offsets = [6, 0, 0], sizes = [1, 8, 32], strides = [1, 1, 1]} : vector<8x8x32xf32> to vector<1x8x32xf32>
    %44 = vector.shape_cast %43 : vector<1x8x32xf32> to vector<8x32xf32>
    %cst_13 = arith.constant dense<0.000000e+00> : vector<8x32xf32>
    %45 = tpu.matmul %42, %0, %cst_13 {dimension_numbers = #tpu.dot_dimension_numbers<[1], [0], [0], [1], [0, 0, 1, 1], [], []>} : vector<8x32xf32>, vector<32x32xf32>, vector<8x32xf32> -> vector<8x32xf32>
    %46 = arith.addf %44, %45 : vector<8x32xf32>
    %47 = math.tanh %46 : vector<8x32xf32>
    %48 = vector.extract_strided_slice %11 {offsets = [7, 0, 0], sizes = [1, 8, 32], strides = [1, 1, 1]} : vector<8x8x32xf32> to vector<1x8x32xf32>
    %49 = vector.shape_cast %48 : vector<1x8x32xf32> to vector<8x32xf32>
    %cst_14 = arith.constant dense<0.000000e+00> : vector<8x32xf32>
    %50 = tpu.matmul %47, %0, %cst_14 {dimension_numbers = #tpu.dot_dimension_numbers<[1], [0], [0], [1], [0, 0, 1, 1], [], []>} : vector<8x32xf32>, vector<32x32xf32>, vector<8x32xf32> -> vector<8x32xf32>
    %51 = arith.addf %49, %50 : vector<8x32xf32>
    %52 = math.tanh %51 : vector<8x32xf32>
    %c0_15 = arith.constant 0 : index
    %c0_16 = arith.constant 0 : index
    %53 = vector.load %arg4[%c0_15, %c0_16] : memref<32x128xf32, #tpu.memory_space<vmem>>, vector<32x128xf32>
    %cst_17 = arith.constant dense<0.000000e+00> : vector<8x128xf32>
    %54 = tpu.matmul %52, %53, %cst_17 {dimension_numbers = #tpu.dot_dimension_numbers<[1], [0], [0], [1], [0, 0, 1, 1], [], []>} : vector<8x32xf32>, vector<32x128xf32>, vector<8x128xf32> -> vector<8x128xf32>
    %c0_18 = arith.constant 0 : index
    %c0_19 = arith.constant 0 : index
    %55 = vector.load %arg5[%c0_18, %c0_19] : memref<1x128xf32, #tpu.memory_space<vmem>>, vector<1x128xf32>
    %56 = vector.broadcast %55 : vector<1x128xf32> to vector<8x128xf32>
    %57 = arith.addf %54, %56 : vector<8x128xf32>
    %c0_20 = arith.constant 0 : index
    %c0_21 = arith.constant 0 : index
    %58 = vector.load %arg6[%c0_20, %c0_21] : memref<8x128xf32, #tpu.memory_space<vmem>>, vector<8x128xf32>
    tpu.vector_store %arg6[%c0_20, %c0_21], %57 {strides = array<i32>} : memref<8x128xf32, #tpu.memory_space<vmem>>, vector<8x128xf32>,
    return
  }
}

</mosaic_0001>

<bundles_post_ra>
// kernel: tpu_custom_call.1
= control target key start
LH: loop header
LB: loop body
LE: loop exit
PB: predicated region body
PF: predicated region fallthrough
CT: control target
= control target key end

     0   :  { %11 = vsyncpa [#allocation3], 0  ;;  %s1396_s0 = inlined_call_operand.hbm [shape: f32[8,8], index: 0, kind: input, shape index: {}]   ;;  %s1397_s1 = inlined_call_operand.vmem [shape: f32[1,32], index: 1, kind: input, shape index: {}]   ;;  %s1398_s2 = inlined_call_operand.hbm [shape: f32[32,32], index: 2, kind: input, shape index: {}]   ;;  %s1399_s3 = inlined_call_operand.vmem [shape: f32[1,32], index: 3, kind: input, shape index: {}]   ;;  %s1400_s4 = inlined_call_operand.hbm [shape: f32[32,128], index: 4, kind: input, shape index: {}]   ;;  %s1401_s5 = inlined_call_operand.vmem [shape: f32[1,128], index: 5, kind: input, shape index: {}]   ;;  %s1402_s6 = inlined_call_operand.hbm [shape: f32[8,128], index: 6, kind: output, shape index: {}]  }
   0x1   :  { %12 = vsyncpa [#allocation6], 0 }
   0x2   :  { %13 = vsyncpa [#allocation4], 0  ;;  %s1184_s21 = smov [#allocation5]   ;;  %s1090_s25 = scalar_lea.hbm %s1398_s2, 512 }
   0x3   :  { %s31_s22 = sshll.u32 %s1184_s21, 4  ;;  %p1091_p0 = scmp.ne.s32.totalorder %s1398_s2, %s1090_s25  ;;  %s32_s22 = int_to_ptr.vmem [resolvable:$true] %s31_s22 }
   0x4   :  { %p1094_p1 = scmp.lt.u32.totalorder %s1090_s25, %s1398_s2 }
   0x6   :  { %p1096_p2 = pnand %p1094_p1, %p1091_p0 }
   0x8   :  { %1099 = shalt.err (!%p1096_p2)
}
   0x9   :  { %s1100_s30 = scalar_lea.vmem %s32_s22, 512  ;;  %p1105_p4 = scmp.lt.s32.totalorder %s32_s22, %s32_s22 }
   0xa   :  { %p1101_p3 = scmp.ne.s32.totalorder %s32_s22, %s1100_s30  ;;  %p1106_p5 = scmp.lt.s32.totalorder %s1100_s30, %s1100_s30 }
   0xc   :  { %p1107_p6 = por %p1106_p5, %p1105_p4 }
   0xe   :  { %p1108_p7 = pnand %p1107_p6, %p1101_p3 }
  0x10   :  { %1111 = shalt.err (!%p1108_p7)
}
  0x11   :  { %s1185_s7 = smov 128   ;;  %s1186_s8 = smov 8  }
  0x12   :  { %37 = dma.hbm_to_vmem [thread:$0]  %s1398_s2, 512, %s32_s22, [#allocation6], %s1185_s7, %s1185_s7, %s1186_s8  }
  0x13   :  { %s1187_s11 = smov [#allocation2]   ;;  %s1188_s13 = smov [#allocation7]  }
  0x14   :  { %s20_s12 = sshll.u32 %s1187_s11, 4  ;;  %s45_s14 = sshll.u32 %s1188_s13, 4  ;;  %s21_s12 = int_to_ptr.vmem [resolvable:$true] %s20_s12  ;;  %s46_s14 = int_to_ptr.vmem [resolvable:$true] %s45_s14 }
  0x15   :  { %s1112_s17 = scalar_lea.hbm %s1396_s0, 128 }
  0x16   :  { %p1113_p8 = scmp.ne.s32.totalorder %s1396_s0, %s1112_s17  ;;  %p1116_p9 = scmp.lt.u32.totalorder %s1112_s17, %s1396_s0 }
  0x18   :  { %p1118_p10 = pnand %p1116_p9, %p1113_p8 }
  0x1a   :  { %1121 = shalt.err (!%p1118_p10)
}
  0x1b   :  { %s1122_s2 = scalar_lea.vmem %s21_s12, 128  ;;  %p1127_p12 = scmp.lt.s32.totalorder %s21_s12, %s21_s12 }
  0x1c   :  { %p1123_p11 = scmp.ne.s32.totalorder %s21_s12, %s1122_s2  ;;  %p1128_p13 = scmp.lt.s32.totalorder %s1122_s2, %s1122_s2 }
  0x1e   :  { %p1129_p0 = por %p1128_p13, %p1127_p12 }
  0x20   :  { %p1130_p1 = pnand %p1129_p0, %p1123_p11 }
  0x22   :  { %1133 = shalt.err (!%p1130_p1)
}
  0x23   :  { %23 = dma.hbm_to_vmem [thread:$0]  %s1396_s0, 128, %s21_s12, [#allocation3]  }
  0x24   :  { %s1134_s26 = scalar_lea.hbm %s1400_s4, 512 }
  0x25   :  { %p1135_p2 = scmp.ne.s32.totalorder %s1400_s4, %s1134_s26  ;;  %p1138_p3 = scmp.lt.u32.totalorder %s1134_s26, %s1400_s4 }
  0x27   :  { %p1140_p4 = pnand %p1138_p3, %p1135_p2 }
  0x29   :  { %1143 = shalt.err (!%p1140_p4)
}
  0x2a   :  { %s1144_s9 = scalar_lea.vmem %s46_s14, 512  ;;  %p1149_p6 = scmp.lt.s32.totalorder %s46_s14, %s46_s14 }
  0x2b   :  { %p1145_p5 = scmp.ne.s32.totalorder %s46_s14, %s1144_s9  ;;  %p1150_p7 = scmp.lt.s32.totalorder %s1144_s9, %s1144_s9 }
  0x2d   :  { %p1151_p8 = por %p1150_p7, %p1149_p6 }
  0x2f   :  { %p1152_p9 = pnand %p1151_p8, %p1145_p5 }
  0x31   :  { %1155 = shalt.err (!%p1152_p9)
}
  0x32   :  { %51 = dma.hbm_to_vmem [thread:$0]  %s1400_s4, 512, %s46_s14, [#allocation6], %s1185_s7, %s1185_s7, %s1186_s8  }
  0x33   :  { %1178 = dma.done.wait [#allocation3], 128  }
  0x34   :  { %1179 = vsyncadd [#allocation3], 4294967168 }
  0x35   :  { %1180 = dma.done.wait [#allocation6], 1024  }
  0x36   :  { %1181 = vsyncadd [#allocation6], 4294966272  ;;  %v68_v0 = vlaneseq  ;;  %v1189_v1 = vmov 0.0|0.0   ;;  %vm1190_vm0 = vmmov 0   ;;  %v1191_v2 = vmov 0.0   ;;  %v63_v5 = vld [vmem:[#allocation5] sm:$0xff] }
  0x37   :  { %1011 = vmatprep.subr.bf16.mxu0 %v1189_v1  ;;  %920 = vmatprep.mubr.msk.f32.mxu0 %vm1190_vm0, %v1191_v2  ;;  %v64_v6 = vld [vmem:[#allocation5 + $0x8] sm:$0xff]  ;;  %v65_v7 = vld [vmem:[#allocation5 + $0x10] sm:$0xff]  ;;  %v66_v9 = vld [vmem:[#allocation5 + $0x18] sm:$0xff]  ;;  %vm154_vm1 = vcmask 261120   ;;  %s1192_s12 = smov [#allocation8]  }
  0x38   :  { %v1273_v3 = vshrl.u32 %v68_v0, 7  ;;  %1017 = vmatprep.subr.bf16.mxu1 %v1189_v1  ;;  %931 = vmatprep.mubr.msk.f32.mxu1 %vm1190_vm0, %v1191_v2  ;;  %v1279_v8 = vpack.c.bf16 %v64_v6, %v63_v5  ;;  %v1281_v10 = vld [vmem:[#allocation2] sm:$0xff]  ;;  %v1285_v12 = vpack.c.bf16 %v66_v9, %v65_v7  ;;  %s846_s13 = sshll.u32 %s1192_s12, 4  ;;  %s847_s13 = int_to_ptr.vmem [resolvable:$true] %s846_s13 }
  0x39   :  { %v1306_v15 = vld [vmem:[%s1397_s1] ss:$0 sm:$0xff]  ;;  %s1156_s14 = scalar_lea.vmem %s847_s13, 128  ;;  %p1161_p11 = scmp.lt.s32.totalorder %s847_s13, %s847_s13 }
  0x3a   :  { %v70_v4 = vsub.s32 0, %v1273_v3  ;;  %1013 = vmatpush3.bf16.msra.mxu0 %v1279_v8  ;;  %1019 = vmatpush3.bf16.msra.mxu1 %v1279_v8  ;;  %v77_v13 = vsub.s32 1, %v1273_v3  ;;  %v1312_v18 = vld [vmem:[%s1399_s3] ss:$0 sm:$0xff]  ;;  %v84_v24 = vsub.s32 2, %v1273_v3  ;;  %v91_v33 = vsub.s32 3, %v1273_v3  ;;  %p1157_p10 = scmp.ne.s32.totalorder %s847_s13, %s1156_s14  ;;  %p1162_p12 = scmp.lt.s32.totalorder %s1156_s14, %s1156_s14 }
  0x3b   :  { %1014 = vmatprep.subr.bf16.mxu0 %v1189_v1  ;;  %1020 = vmatprep.subr.bf16.mxu1 %v1189_v1  ;;  %v98_v42 = vsub.s32 4, %v1273_v3  ;;  %v105_v51 = vsub.s32 5, %v1273_v3  ;;  %v112_v60 = vsub.s32 6, %v1273_v3 }
  0x3c   :  { %v71_v11 = vrot.slane %v1281_v10, %v70_v4  ;;  %v78_v14 = vrot.slane %v1281_v10, %v77_v13  ;;  %v85_v25 = vrot.slane %v1281_v10, %v84_v24  ;;  %v92_v34 = vrot.slane %v1281_v10, %v91_v33  ;;  %p1163_p13 = por %p1162_p12, %p1161_p11 }
  0x3d   :  { %v99_v43 = vrot.slane %v1281_v10, %v98_v42  ;;  %v106_v52 = vrot.slane %v1281_v10, %v105_v51  ;;  %v113_v61 = vrot.slane %v1281_v10, %v112_v60 }
  0x3e   :  { %73 = vbcast.lane.b32.xlu0 %v71_v11, 256  ;;  %1016 = vmatpush3.bf16.msra.mxu0 %v1285_v12  ;;  %p1164_p0 = pnand %p1163_p13, %p1157_p10 }
  0x3f   :  { %1022 = vmatpush3.bf16.msra.mxu1 %v1285_v12  ;;  %1023 = vmatprep.subr.bf16.mxu0 %v1189_v1 }
  0x40   :  { %1029 = vmatprep.subr.bf16.mxu1 %v1189_v1  ;;  %87 = vbcast.lane.b32.xlu1 %v85_v25, 256 }
  0x41   :  { %921 = vmatmul.mubr.f32.vlgmr.msra.gmra.mrb[0].mxu0 %v1191_v2 }
  0x42   :  { %1025 = vmatpush3.bf16.msra.mxu0 %v1279_v8  ;;  %942 = vmatprep.mubr.msk.f32.mxu0 %vm1190_vm0, %v1191_v2 }
  0x43   :  { %1026 = vmatprep.subr.bf16.mxu0 %v1189_v1  ;;  %80 = vbcast.lane.b32.xlu0 %v78_v14, 256 }
  0x44   :  { %94 = vbcast.lane.b32.xlu1 %v92_v34, 256 }
  0x46   :  { %1028 = vmatpush3.bf16.msra.mxu0 %v1285_v12 }
  0x47   :  { %1035 = vmatprep.subr.bf16.mxu0 %v1189_v1  ;;  %101 = vbcast.lane.b32.xlu0 %v99_v43, 256 }
  0x48   :  { %108 = vbcast.lane.b32.xlu1 %v106_v52, 256 }
  0x4b   :  { %115 = vbcast.lane.b32.xlu0 %v113_v61, 256 }
  0xb0   :  { %v74_v16 = vpop.permute.xlu0 %73 }
  0xb1   :  { %v131_v17 = vmul.f32 %v1306_v15, %v74_v16 }
  0xb2   :  { %v88_v35 = vpop.permute.xlu1 %87 }
  0xb3   :  { %v146_v19 = vadd.f32 %v1312_v18, %v131_v17  ;;  %v133_v36 = vmul.f32 %v1306_v15, %v88_v35 }
  0xb5   :  { %v81_v26 = vpop.permute.xlu0 %80  ;;  %v148_v37 = vadd.f32 %v1312_v18, %v133_v36 }
  0xb6   :  { %v132_v27 = vmul.f32 %v1306_v15, %v81_v26  ;;  %v95_v44 = vpop.permute.xlu1 %94 }
  0xb7   :  { %v134_v45 = vmul.f32 %v1306_v15, %v95_v44 }
  0xb8   :  { %v147_v28 = vadd.f32 %v1312_v18, %v132_v27 }
  0xb9   :  { %v149_v46 = vadd.f32 %v1312_v18, %v134_v45  ;;  %v102_v53 = vpop.permute.xlu0 %101 }
  0xba   :  { %v135_v54 = vmul.f32 %v1306_v15, %v102_v53  ;;  %v109_v62 = vpop.permute.xlu1 %108 }
  0xbb   :  { %v136_v63 = vmul.f32 %v1306_v15, %v109_v62 }
  0xbc   :  { %v150_v55 = vadd.f32 %v1312_v18, %v135_v54 }
  0xbd   :  { %v151_v0 = vadd.f32 %v1312_v18, %v136_v63  ;;  %v116_v11 = vpop.permute.xlu0 %115 }
 0x114   :  { %v224_v20 = vpop.f32.mrb[0].mxu0 }
 0x115   :  { %v228_v21 = vadd.f32 %v224_v20, %v146_v19  ;;  %v922_v22 = vpop.f32.mrb[1].mxu0  ;;  %v755_v20 = vld [vmem:[#allocation7] sm:$0xff] }
 0x117   :  { %1074 = vtanh.f32 %v228_v21  ;;  %v756_v21 = vld [vmem:[#allocation7 + $0x8] sm:$0xff] }
 0x118   :  { %v1060_v22 = vpack.c.bf16 %v756_v21, %v755_v20 }
 0x121   :  { %v1075_v23 = vpop.eup %1074 }
 0x122   :  { %932 = vmatmul.mubr.msk.f32.vlgmr.msra.gmra.mrb[0].mxu1 %vm154_vm1, %v1075_v23 }
 0x123   :  { %1031 = vmatpush3.bf16.msra.mxu1 %v1279_v8  ;;  %953 = vmatprep.mubr.msk.f32.mxu1 %vm1190_vm0, %v1191_v2 }
 0x124   :  { %1032 = vmatprep.subr.bf16.mxu1 %v1189_v1 }
 0x127   :  { %1034 = vmatpush3.bf16.msra.mxu1 %v1285_v12 }
 0x128   :  { %1041 = vmatprep.subr.bf16.mxu1 %v1189_v1 }
 0x1f5   :  { %v299_v29 = vpop.f32.mrb[0].mxu1 }
 0x1f6   :  { %v303_v30 = vadd.f32 %v299_v29, %v147_v28  ;;  %v933_v31 = vpop.f32.mrb[1].mxu1 }
 0x1f8   :  { %1076 = vtanh.f32 %v303_v30  ;;  %v865_v30 = vld [vmem:[%s1401_s5] ss:$0 sm:$0xff] }
 0x202   :  { %v1077_v32 = vpop.eup %1076 }
 0x203   :  { %943 = vmatmul.mubr.msk.f32.vlgmr.msra.gmra.mrb[2].mxu0 %vm154_vm1, %v1077_v32 }
 0x204   :  { %1037 = vmatpush3.bf16.msra.mxu0 %v1279_v8  ;;  %964 = vmatprep.mubr.msk.f32.mxu0 %vm1190_vm0, %v1191_v2 }
 0x205   :  { %1038 = vmatprep.subr.bf16.mxu0 %v1189_v1 }
 0x208   :  { %1040 = vmatpush3.bf16.msra.mxu0 %v1285_v12 }
 0x209   :  { %1047 = vmatprep.subr.bf16.mxu0 %v1189_v1 }
 0x2d6   :  { %v374_v38 = vpop.f32.mrb[2].mxu0 }
 0x2d7   :  { %v378_v39 = vadd.f32 %v374_v38, %v148_v37  ;;  %v944_v40 = vpop.f32.mrb[3].mxu0 }
 0x2d9   :  { %1078 = vtanh.f32 %v378_v39 }
 0x2e3   :  { %v1079_v41 = vpop.eup %1078 }
 0x2e4   :  { %954 = vmatmul.mubr.msk.f32.vlgmr.msra.gmra.mrb[2].mxu1 %vm154_vm1, %v1079_v41 }
 0x2e5   :  { %1043 = vmatpush3.bf16.msra.mxu1 %v1279_v8  ;;  %975 = vmatprep.mubr.msk.f32.mxu1 %vm1190_vm0, %v1191_v2 }
 0x2e6   :  { %1044 = vmatprep.subr.bf16.mxu1 %v1189_v1 }
 0x2e9   :  { %1046 = vmatpush3.bf16.msra.mxu1 %v1285_v12 }
 0x2ea   :  { %1053 = vmatprep.subr.bf16.mxu1 %v1189_v1 }
 0x3b7   :  { %v449_v47 = vpop.f32.mrb[2].mxu1 }
 0x3b8   :  { %v453_v48 = vadd.f32 %v449_v47, %v149_v46  ;;  %v955_v49 = vpop.f32.mrb[3].mxu1 }
 0x3ba   :  { %1080 = vtanh.f32 %v453_v48 }
 0x3c4   :  { %v1081_v50 = vpop.eup %1080 }
 0x3c5   :  { %965 = vmatmul.mubr.msk.f32.vlgmr.msra.gmra.mrb[4].mxu0 %vm154_vm1, %v1081_v50 }
 0x3c6   :  { %1049 = vmatpush3.bf16.msra.mxu0 %v1279_v8  ;;  %986 = vmatprep.mubr.msk.f32.mxu0 %vm1190_vm0, %v1191_v2 }
 0x3c7   :  { %1050 = vmatprep.subr.bf16.mxu0 %v1189_v1 }
 0x3ca   :  { %1052 = vmatpush3.bf16.msra.mxu0 %v1285_v12 }
 0x3cb   :  { %1059 = vmatprep.subr.bf16.mxu0 %v1189_v1 }
 0x498   :  { %v524_v56 = vpop.f32.mrb[4].mxu0 }
 0x499   :  { %v528_v57 = vadd.f32 %v524_v56, %v150_v55  ;;  %v966_v58 = vpop.f32.mrb[5].mxu0 }
 0x49b   :  { %1082 = vtanh.f32 %v528_v57 }
 0x4a5   :  { %v1083_v59 = vpop.eup %1082 }
 0x4a6   :  { %976 = vmatmul.mubr.msk.f32.vlgmr.msra.gmra.mrb[4].mxu1 %vm154_vm1, %v1083_v59 }
 0x4a7   :  { %1055 = vmatpush3.bf16.msra.mxu1 %v1279_v8  ;;  %997 = vmatprep.mubr.msk.f32.mxu1 %vm1190_vm0, %v1191_v2  ;;  %v119_v8 = vsub.s32 7, %v1273_v3  ;;  %v758_v3 = vld [vmem:[#allocation7 + $0x18] sm:$0xff] }
 0x4a8   :  { %1056 = vmatprep.subr.bf16.mxu1 %v1189_v1 }
 0x4a9   :  { %v120_v9 = vrot.slane %v1281_v10, %v119_v8 }
 0x4ab   :  { %1058 = vmatpush3.bf16.msra.mxu1 %v1285_v12  ;;  %122 = vbcast.lane.b32.xlu1 %v120_v9, 256  ;;  %v137_v12 = vmul.f32 %v1306_v15, %v116_v11 }
 0x4ad   :  { %v152_v13 = vadd.f32 %v1312_v18, %v137_v12 }
 0x51d   :  { %v123_v23 = vpop.permute.xlu1 %122 }
 0x51e   :  { %v138_v24 = vmul.f32 %v1306_v15, %v123_v23 }
 0x520   :  { %v153_v25 = vadd.f32 %v1312_v18, %v138_v24 }
 0x579   :  { %v599_v4 = vpop.f32.mrb[4].mxu1 }
 0x57a   :  { %v603_v5 = vadd.f32 %v599_v4, %v151_v0  ;;  %v977_v6 = vpop.f32.mrb[5].mxu1 }
 0x57c   :  { %1084 = vtanh.f32 %v603_v5 }
 0x586   :  { %v1085_v7 = vpop.eup %1084 }
 0x587   :  { %987 = vmatmul.mubr.msk.f32.vlgmr.msra.gmra.mrb[6].mxu0 %vm154_vm1, %v1085_v7 }
 0x588   :  { %1008 = vmatprep.mubr.msk.f32.mxu0 %vm1190_vm0, %v1191_v2  ;;  %v757_v2 = vld [vmem:[#allocation7 + $0x10] sm:$0xff]  ;;  %1061 = vmatpush3.bf16.msra.mxu0 %v1060_v22 }
 0x589   :  { %v1063_v10 = vpack.c.bf16 %v758_v3, %v757_v2  ;;  %1062 = vmatprep.subr.bf16.mxu0 %v1189_v1 }
 0x58c   :  { %1064 = vmatpush3.bf16.msra.mxu0 %v1063_v10 }
 0x65a   :  { %v674_v14 = vpop.f32.mrb[6].mxu0 }
 0x65b   :  { %v678_v16 = vadd.f32 %v674_v14, %v152_v13  ;;  %v988_v17 = vpop.f32.mrb[7].mxu0 }
 0x65d   :  { %1086 = vtanh.f32 %v678_v16 }
 0x667   :  { %v1087_v19 = vpop.eup %1086 }
 0x668   :  { %998 = vmatmul.mubr.msk.f32.vlgmr.msra.gmra.mrb[6].mxu1 %vm154_vm1, %v1087_v19 }
 0x73b   :  { %v749_v26 = vpop.f32.mrb[6].mxu1 }
 0x73c   :  { %v753_v27 = vadd.f32 %v749_v26, %v153_v25  ;;  %v999_v28 = vpop.f32.mrb[7].mxu1 }
 0x73e   :  { %1088 = vtanh.f32 %v753_v27 }
 0x748   :  { %v1089_v29 = vpop.eup %1088 }
 0x749   :  { %1009 = vmatmul.mubr.msk.f32.vlgmr.msra.gmra.mrb[8].mxu0 %vm154_vm1, %v1089_v29 }
 0x81c   :  { %v835_v1 = vpop.f32.mrb[8].mxu0 }
 0x81d   :  { %v836_v31 = vadd.f32 %v865_v30, %v835_v1  ;;  %v1010_v32 = vpop.f32.mrb[9].mxu0 }
 0x81f   :  { %839 = vst [vmem:[#allocation8] sm:$0xff] %v836_v31 }
 0x820   :  { %1167 = shalt.err (!%p1164_p0)
}
 0x821   :  { %s1168_s17 = scalar_lea.hbm %s1402_s6, 128 }
 0x822   :  { %p1169_p1 = scmp.ne.s32.totalorder %s1402_s6, %s1168_s17  ;;  %p1172_p2 = scmp.lt.u32.totalorder %s1168_s17, %s1402_s6 }
 0x824   :  { %p1174_p3 = pnand %p1172_p2, %p1169_p1 }
 0x826   :  { %1177 = shalt.err (!%p1174_p3)
}
 0x827   :  { %849 = dma.vmem_to_hbm [thread:$0]  %s847_s13, 128, %s1402_s6, [#allocation4]  }
 0x828   :  { %1182 = dma.done.wait [#allocation4], 128  }
 0x829   :  { %1183 = vsyncadd [#allocation4], 4294967168 }
 0x82a   :  { %853 = vsyncpa [#allocation3], 1 }
 0x82b   :  { %854 = vsyncpa [#allocation6], 1 }
 0x82c   :  { %855 = vsyncpa [#allocation4], 1 }

</bundles_post_ra>
